<compile_context>
chip_gen: v5e
topology: v5e:2x2
jax: 0.10.0
libtpu: 0.0.40
codegen_flags: <defaults>
</compile_context>

<pallas_src>
import math
import numpy as np
import jax
import jax.numpy as jnp
from jax.experimental import pallas as pl
from jax.experimental.pallas import tpu as pltpu


def ae_layer_dims(input_length: int, hidden_size: int):
    """Replicates the layer-size construction in AEModel.__init__."""
    # NOTE: float-start/stop np.arange kept as-is to match the PyTorch spec.
    dec_steps = 2 ** np.arange(
        max(np.ceil(np.log2(hidden_size)), 2), np.log2(input_length)
    )[1:]
    dec_setup = np.concatenate([[hidden_size], dec_steps.repeat(2), [input_length]])
    enc_setup = dec_setup[::-1]
    enc_dims = [(int(a), int(b)) for a, b in enc_setup.reshape(-1, 2)]
    dec_dims = [(int(a), int(b)) for a, b in dec_setup.reshape(-1, 2)]
    return enc_dims, dec_dims


def init_params(key, enc_dims, dec_dims):
    """PyTorch-Linear-style init: U(-1/sqrt(fan_in), 1/sqrt(fan_in)).

    Stored as (in, out) weights and (1, out) biases (so ref does h @ w + b)."""
    params = []
    for (fan_in, fan_out) in enc_dims + dec_dims:
        key, kw, kb = jax.random.split(key, 3)
        bound = 1.0 / math.sqrt(fan_in)
        w = jax.random.uniform(kw, (fan_in, fan_out), jnp.float32, -bound, bound)
        b = jax.random.uniform(kb, (1, fan_out), jnp.float32, -bound, bound)
        params.extend([w, b])
    return params


def _tanh_dtype():
    """bf16 tanh on bf16-EUP chips (v6e / v7x); f32 elsewhere (v5e has no bf16 EUP)."""
    try:
        kind = jax.devices()[0].device_kind.lower()
    except Exception:
        kind = ""
    if ("v6" in kind) or ("v7" in kind) or ("trillium" in kind):
        return jnp.bfloat16
    return jnp.float32


def make_ae_kernel(n_enc: int, n_dec: int, tanh_dtype):
    def kernel(*refs):
        # refs = [x, w0, b0, ..., wN, bN, rec_out, enc_t_out]
        x_ref = refs[0]
        prm = refs[1:1 + 2 * (n_enc + n_dec)]
        rec_ref = refs[-2]
        enc_ref = refs[-1]

        # Batch-on-lanes: every activation is (width, TB); the 128-lane axis is
        # the batch, so bias/tanh/cast vregs are lane-dense despite widths 4..32.
        x = x_ref[...].astype(jnp.float32)            # match PyTorch .float()
        h = jnp.transpose(x).astype(jnp.bfloat16)     # (L, TB); one XLU transpose

        def linear_t(h_bf16, w_ref, b_ref):
            # w: (out, in) bf16 (pre-cast once in wrapper); f32 MXU accumulation.
            y = jnp.dot(w_ref[...], h_bf16, preferred_element_type=jnp.float32)
            return y + b_ref[...]                     # bias (out, 1) broadcasts over lanes

        idx = 0
        # encoder: Linear, Tanh, ..., Linear (no trailing Tanh)
        for i in range(n_enc):
            y = linear_t(h, prm[idx], prm[idx + 1]); idx += 2
            if i + 1 < n_enc:
                h = jnp.tanh(y.astype(tanh_dtype)).astype(jnp.bfloat16)
        enc_ref[...] = y                              # (H, TB) f32, lane-dense store
        h = y.astype(jnp.bfloat16)

        # decoder: Linear, Tanh, ..., Linear (no trailing Tanh)
        for i in range(n_dec):
            y = linear_t(h, prm[idx], prm[idx + 1]); idx += 2
            if i + 1 < n_dec:
                h = jnp.tanh(y.astype(tanh_dtype)).astype(jnp.bfloat16)

        rec_ref[...] = jnp.transpose(y)               # (TB, L) f32; XLU otherwise idle
    return kernel


def ae_forward(ts_batch, params, enc_dims, dec_dims,
               return_latent: bool = False, tile_b: int = 8192):
    B = ts_batch.shape[0]
    L = int(np.prod(ts_batch.shape[1:]))
    H = enc_dims[-1][1]
    n_enc, n_dec = len(enc_dims), len(dec_dims)
    n_layers = n_enc + n_dec
    assert len(params) == 2 * n_layers

    # Flatten only; no wrapper-side cast / pad (kernel casts, Pallas masks edges).
    x = ts_batch.reshape(B, L)

    # TB is ALWAYS a multiple of 128 so that
    #   * the (TB, L) x / rec blocks satisfy the sublane (8) rule,
    #   * the transposed (H, TB) enc block satisfies the lane (128) rule,
    #   * in-kernel transposes stay tile-aligned.
    # B % TB != 0 (including B < 128) is handled by Pallas's masked edge-block
    # DMA: no jnp.pad of x, no [:B] slices of the outputs.
    tile_b = max(128, (int(tile_b) // 128) * 128)
    half = pl.cdiv(B, 2)
    two_way = max(128, ((half + 127) // 128) * 128)   # >=2 grid steps when B > 128 (v7x: 2 TCs)
    TB = min(tile_b, two_way)
    grid = (pl.cdiv(B, TB),)

    # One-time param prep: PyTorch-native (out, in) weights pre-cast to bf16,
    # biases kept f32 as (out, 1).
    kparams = []
    for li in range(n_layers):
        w = params[2 * li]          # (in, out) f32
        b = params[2 * li + 1]      # (1, out) f32
        kparams.append(jnp.asarray(w, jnp.float32).T.astype(jnp.bfloat16))   # (out, in) bf16
        kparams.append(jnp.asarray(b, jnp.float32).reshape(1, -1).T)         # (out, 1) f32

    in_specs = [pl.BlockSpec((TB, L), lambda i: (i, 0))]
    for kp in kparams:
        # Full-array block, constant index map -> DMA'd once, VMEM-resident.
        in_specs.append(pl.BlockSpec(kp.shape, lambda i: (0, 0)))

    out_specs = (
        pl.BlockSpec((TB, L), lambda i: (i, 0)),   # rec (B, L)
        pl.BlockSpec((H, TB), lambda i: (0, i)),   # enc transposed (H, B): lane-dense store
    )
    out_shape = (
        jax.ShapeDtypeStruct((B, L), jnp.float32),
        jax.ShapeDtypeStruct((H, B), jnp.float32),
    )

    # Advisory cost estimate (rows actually computed, incl. the masked tail block).
    all_dims = enc_dims + dec_dims
    rows = grid[0] * TB
    flops = 2 * rows * sum(a * b for a, b in all_dims)
    tanh_widths = [b for _, b in enc_dims[:-1]] + [b for _, b in dec_dims[:-1]]
    transcendentals = rows * sum(tanh_widths)
    param_bytes = sum(int(np.prod(kp.shape)) * kp.dtype.itemsize for kp in kparams)
    bytes_accessed = (int(x.size) * x.dtype.itemsize   # x read
                      + B * L * 4                      # rec write
                      + B * H * 4                      # enc write
                      + param_bytes)                   # params (read once, resident)

    rec, enc_t = pl.pallas_call(
        make_ae_kernel(n_enc, n_dec, _tanh_dtype()),
        grid=grid,
        out_shape=out_shape,
        in_specs=in_specs,
        out_specs=out_specs,
        compiler_params=pltpu.CompilerParams(
            dimension_semantics=("parallel",),
            vmem_limit_bytes=48 * 1024 * 1024),
        cost_estimate=pl.CostEstimate(
            flops=int(flops),
            transcendentals=int(transcendentals),
            bytes_accessed=int(bytes_accessed)),
    )(x, *kparams)

    reconstructed = rec.reshape(ts_batch.shape)
    if return_latent:
        return reconstructed, enc_t.T   # tiny (H, B) -> (B, H) fix-up in the wrapper
    return reconstructed


def ae_forward_ref(ts_batch, params, enc_dims, dec_dims):
    """Pure-JAX f32 reference matching the PyTorch forward."""
    B = ts_batch.shape[0]
    x = ts_batch.reshape(B, -1).astype(jnp.float32)
    n_enc, n_dec = len(enc_dims), len(dec_dims)
    h = x
    idx = 0
    for i in range(n_enc):
        w, b = params[idx], params[idx + 1]
        idx += 2
        h = h @ w + b
        if i < n_enc - 1:
            h = jnp.tanh(h)
    enc = h
    for i in range(n_dec):
        w, b = params[idx], params[idx + 1]
        idx += 2
        h = h @ w + b
        if i < n_dec - 1:
            h = jnp.tanh(h)
    return h.reshape(ts_batch.shape), enc


if __name__ == "__main__":
    # ts_batch: (batch=2, seq=8, feat=4) -> input_length = 32, hidden_size = 4
    B, S, F = 2, 8, 4
    input_length = S * F
    hidden_size = 4

    enc_dims, dec_dims = ae_layer_dims(input_length, hidden_size)
    # enc_dims = [(32,16),(16,8),(8,4)], dec_dims = [(4,8),(8,16),(16,32)]

    key = jax.random.PRNGKey(0)
    key, kx = jax.random.split(key)
    ts_batch = jax.random.normal(kx, (B, S, F), dtype=jnp.float32)
    params = init_params(key, enc_dims, dec_dims)

    # bf16 MXU operands (+ bf16 tanh on v6e/v7x) with f32 accumulation -> loosened tol.
    ATOL = RTOL = 5e-2

    rec, enc = ae_forward(ts_batch, params, enc_dims, dec_dims, return_latent=True)
    rec = jax.block_until_ready(rec)
    enc = jax.block_until_ready(enc)

    rec_ref, enc_ref = ae_forward_ref(ts_batch, params, enc_dims, dec_dims)
    assert rec.shape == ts_batch.shape
    assert enc.shape == (B, hidden_size)
    np.testing.assert_allclose(np.asarray(rec), np.asarray(rec_ref), atol=ATOL, rtol=RTOL)
    np.testing.assert_allclose(np.asarray(enc), np.asarray(enc_ref), atol=ATOL, rtol=RTOL)

    # Multi-step grids with a masked partial trailing block (B=300):
    #   default tile -> TB=256, grid=(2,);  explicit tile_b=128 -> TB=128, grid=(3,).
    B2 = 300
    key, kx2 = jax.random.split(key)
    ts_batch2 = jax.random.normal(kx2, (B2, S, F), dtype=jnp.float32)
    rec2_ref, enc2_ref = ae_forward_ref(ts_batch2, params, enc_dims, dec_dims)
    for tb in (8192, 128):
        rec2, enc2 = ae_forward(ts_batch2, params, enc_dims, dec_dims,
                                return_latent=True, tile_b=tb)
        rec2 = jax.block_until_ready(rec2)
        enc2 = jax.block_until_ready(enc2)
        assert rec2.shape == ts_batch2.shape
        assert enc2.shape == (B2, hidden_size)
        np.testing.assert_allclose(np.asarray(rec2), np.asarray(rec2_ref), atol=ATOL, rtol=RTOL)
        np.testing.assert_allclose(np.asarray(enc2), np.asarray(enc2_ref), atol=ATOL, rtol=RTOL)

    print("KERNEL_OK")
</pallas_src>

<mosaic_0001>
module attributes {stable_mosaic.version = 11 : i64} {
  func.func @kernel(%arg0: i32, %arg1: memref<128x32xf32, #tpu.memory_space<vmem>>, %arg2: memref<16x32xbf16, #tpu.memory_space<vmem>>, %arg3: memref<16x1xf32, #tpu.memory_space<vmem>>, %arg4: memref<8x16xbf16, #tpu.memory_space<vmem>>, %arg5: memref<8x1xf32, #tpu.memory_space<vmem>>, %arg6: memref<4x8xbf16, #tpu.memory_space<vmem>>, %arg7: memref<4x1xf32, #tpu.memory_space<vmem>>, %arg8: memref<8x4xbf16, #tpu.memory_space<vmem>>, %arg9: memref<8x1xf32, #tpu.memory_space<vmem>>, %arg10: memref<16x8xbf16, #tpu.memory_space<vmem>>, %arg11: memref<16x1xf32, #tpu.memory_space<vmem>>, %arg12: memref<32x16xbf16, #tpu.memory_space<vmem>>, %arg13: memref<32x1xf32, #tpu.memory_space<vmem>>, %arg14: memref<128x32xf32, #tpu.memory_space<vmem>>, %arg15: memref<4x128xf32, #tpu.memory_space<vmem>>) attributes {dimension_semantics = [#tpu.dimension_semantics<parallel>], iteration_bounds = array<i64: 1>, scalar_prefetch = 0 : i64, scratch_operands = 0 : i64, tpu.core_type = #tpu.core_type<tc>, window_params = [{transform_indices = @transform_0, window_bounds = array<i64: 128, 32>}, {pipeline_mode = #tpu.pipeline_mode<synchronous>, transform_indices = @transform_1, window_bounds = array<i64: 16, 32>}, {pipeline_mode = #tpu.pipeline_mode<synchronous>, transform_indices = @transform_2, window_bounds = array<i64: 16, 1>}, {pipeline_mode = #tpu.pipeline_mode<synchronous>, transform_indices = @transform_3, window_bounds = array<i64: 8, 16>}, {pipeline_mode = #tpu.pipeline_mode<synchronous>, transform_indices = @transform_4, window_bounds = array<i64: 8, 1>}, {pipeline_mode = #tpu.pipeline_mode<synchronous>, transform_indices = @transform_5, window_bounds = array<i64: 4, 8>}, {pipeline_mode = #tpu.pipeline_mode<synchronous>, transform_indices = @transform_6, window_bounds = array<i64: 4, 1>}, {pipeline_mode = #tpu.pipeline_mode<synchronous>, transform_indices = @transform_7, window_bounds = array<i64: 8, 4>}, {pipeline_mode = #tpu.pipeline_mode<synchronous>, transform_indices = @transform_8, window_bounds = array<i64: 8, 1>}, {pipeline_mode = #tpu.pipeline_mode<synchronous>, transform_indices = @transform_9, window_bounds = array<i64: 16, 8>}, {pipeline_mode = #tpu.pipeline_mode<synchronous>, transform_indices = @transform_10, window_bounds = array<i64: 16, 1>}, {pipeline_mode = #tpu.pipeline_mode<synchronous>, transform_indices = @transform_11, window_bounds = array<i64: 32, 16>}, {pipeline_mode = #tpu.pipeline_mode<synchronous>, transform_indices = @transform_12, window_bounds = array<i64: 32, 1>}, {transform_indices = @transform_13, window_bounds = array<i64: 128, 32>}, {transform_indices = @transform_14, window_bounds = array<i64: 4, 128>}]} {
    %c0 = arith.constant 0 : index
    %c0_0 = arith.constant 0 : index
    %0 = vector.load %arg1[%c0, %c0_0] : memref<128x32xf32, #tpu.memory_space<vmem>>, vector<128x32xf32>
    %1 = tpu.transpose %0, [1, 0] : vector<128x32xf32> -> vector<32x128xf32>
    %2 = arith.truncf %1 : vector<32x128xf32> to vector<32x128xbf16>
    %c0_1 = arith.constant 0 : index
    %c0_2 = arith.constant 0 : index
    %3 = vector.load %arg2[%c0_1, %c0_2] : memref<16x32xbf16, #tpu.memory_space<vmem>>, vector<16x32xbf16>
    %cst = arith.constant dense<0.000000e+00> : vector<16x128xf32>
    %4 = tpu.matmul %3, %2, %cst {dimension_numbers = #tpu.dot_dimension_numbers<[1], [0], [0], [1], [0, 0, 1, 1], [], []>} : vector<16x32xbf16>, vector<32x128xbf16>, vector<16x128xf32> -> vector<16x128xf32>
    %c0_3 = arith.constant 0 : index
    %c0_4 = arith.constant 0 : index
    %5 = vector.load %arg3[%c0_3, %c0_4] : memref<16x1xf32, #tpu.memory_space<vmem>>, vector<16x1xf32>
    %6 = vector.broadcast %5 : vector<16x1xf32> to vector<16x128xf32>
    %7 = arith.addf %4, %6 : vector<16x128xf32>
    %8 = math.tanh %7 : vector<16x128xf32>
    %9 = arith.truncf %8 : vector<16x128xf32> to vector<16x128xbf16>
    %c0_5 = arith.constant 0 : index
    %c0_6 = arith.constant 0 : index
    %10 = vector.load %arg4[%c0_5, %c0_6] : memref<8x16xbf16, #tpu.memory_space<vmem>>, vector<8x16xbf16>
    %cst_7 = arith.constant dense<0.000000e+00> : vector<8x128xf32>
    %11 = tpu.matmul %10, %9, %cst_7 {dimension_numbers = #tpu.dot_dimension_numbers<[1], [0], [0], [1], [0, 0, 1, 1], [], []>} : vector<8x16xbf16>, vector<16x128xbf16>, vector<8x128xf32> -> vector<8x128xf32>
    %c0_8 = arith.constant 0 : index
    %c0_9 = arith.constant 0 : index
    %12 = vector.load %arg5[%c0_8, %c0_9] : memref<8x1xf32, #tpu.memory_space<vmem>>, vector<8x1xf32>
    %13 = vector.broadcast %12 : vector<8x1xf32> to vector<8x128xf32>
    %14 = arith.addf %11, %13 : vector<8x128xf32>
    %15 = math.tanh %14 : vector<8x128xf32>
    %16 = arith.truncf %15 : vector<8x128xf32> to vector<8x128xbf16>
    %c0_10 = arith.constant 0 : index
    %c0_11 = arith.constant 0 : index
    %17 = vector.load %arg6[%c0_10, %c0_11] : memref<4x8xbf16, #tpu.memory_space<vmem>>, vector<4x8xbf16>
    %cst_12 = arith.constant dense<0.000000e+00> : vector<4x128xf32>
    %18 = tpu.matmul %17, %16, %cst_12 {dimension_numbers = #tpu.dot_dimension_numbers<[1], [0], [0], [1], [0, 0, 1, 1], [], []>} : vector<4x8xbf16>, vector<8x128xbf16>, vector<4x128xf32> -> vector<4x128xf32>
    %c0_13 = arith.constant 0 : index
    %c0_14 = arith.constant 0 : index
    %19 = vector.load %arg7[%c0_13, %c0_14] : memref<4x1xf32, #tpu.memory_space<vmem>>, vector<4x1xf32>
    %20 = vector.broadcast %19 : vector<4x1xf32> to vector<4x128xf32>
    %21 = arith.addf %18, %20 : vector<4x128xf32>
    %c0_15 = arith.constant 0 : index
    %c0_16 = arith.constant 0 : index
    %22 = vector.load %arg15[%c0_15, %c0_16] : memref<4x128xf32, #tpu.memory_space<vmem>>, vector<4x128xf32>
    tpu.vector_store %arg15[%c0_15, %c0_16], %21 {strides = array<i32>} : memref<4x128xf32, #tpu.memory_space<vmem>>, vector<4x128xf32>,
    %23 = arith.truncf %21 : vector<4x128xf32> to vector<4x128xbf16>
    %c0_17 = arith.constant 0 : index
    %c0_18 = arith.constant 0 : index
    %24 = vector.load %arg8[%c0_17, %c0_18] : memref<8x4xbf16, #tpu.memory_space<vmem>>, vector<8x4xbf16>
    %cst_19 = arith.constant dense<0.000000e+00> : vector<8x128xf32>
    %25 = tpu.matmul %24, %23, %cst_19 {dimension_numbers = #tpu.dot_dimension_numbers<[1], [0], [0], [1], [0, 0, 1, 1], [], []>} : vector<8x4xbf16>, vector<4x128xbf16>, vector<8x128xf32> -> vector<8x128xf32>
    %c0_20 = arith.constant 0 : index
    %c0_21 = arith.constant 0 : index
    %26 = vector.load %arg9[%c0_20, %c0_21] : memref<8x1xf32, #tpu.memory_space<vmem>>, vector<8x1xf32>
    %27 = vector.broadcast %26 : vector<8x1xf32> to vector<8x128xf32>
    %28 = arith.addf %25, %27 : vector<8x128xf32>
    %29 = math.tanh %28 : vector<8x128xf32>
    %30 = arith.truncf %29 : vector<8x128xf32> to vector<8x128xbf16>
    %c0_22 = arith.constant 0 : index
    %c0_23 = arith.constant 0 : index
    %31 = vector.load %arg10[%c0_22, %c0_23] : memref<16x8xbf16, #tpu.memory_space<vmem>>, vector<16x8xbf16>
    %cst_24 = arith.constant dense<0.000000e+00> : vector<16x128xf32>
    %32 = tpu.matmul %31, %30, %cst_24 {dimension_numbers = #tpu.dot_dimension_numbers<[1], [0], [0], [1], [0, 0, 1, 1], [], []>} : vector<16x8xbf16>, vector<8x128xbf16>, vector<16x128xf32> -> vector<16x128xf32>
    %c0_25 = arith.constant 0 : index
    %c0_26 = arith.constant 0 : index
    %33 = vector.load %arg11[%c0_25, %c0_26] : memref<16x1xf32, #tpu.memory_space<vmem>>, vector<16x1xf32>
    %34 = vector.broadcast %33 : vector<16x1xf32> to vector<16x128xf32>
    %35 = arith.addf %32, %34 : vector<16x128xf32>
    %36 = math.tanh %35 : vector<16x128xf32>
    %37 = arith.truncf %36 : vector<16x128xf32> to vector<16x128xbf16>
    %c0_27 = arith.constant 0 : index
    %c0_28 = arith.constant 0 : index
    %38 = vector.load %arg12[%c0_27, %c0_28] : memref<32x16xbf16, #tpu.memory_space<vmem>>, vector<32x16xbf16>
    %cst_29 = arith.constant dense<0.000000e+00> : vector<32x128xf32>
    %39 = tpu.matmul %38, %37, %cst_29 {dimension_numbers = #tpu.dot_dimension_numbers<[1], [0], [0], [1], [0, 0, 1, 1], [], []>} : vector<32x16xbf16>, vector<16x128xbf16>, vector<32x128xf32> -> vector<32x128xf32>
    %c0_30 = arith.constant 0 : index
    %c0_31 = arith.constant 0 : index
    %40 = vector.load %arg13[%c0_30, %c0_31] : memref<32x1xf32, #tpu.memory_space<vmem>>, vector<32x1xf32>
    %41 = vector.broadcast %40 : vector<32x1xf32> to vector<32x128xf32>
    %42 = arith.addf %39, %41 : vector<32x128xf32>
    %43 = tpu.transpose %42, [1, 0] : vector<32x128xf32> -> vector<128x32xf32>
    %c0_32 = arith.constant 0 : index
    %c0_33 = arith.constant 0 : index
    %44 = vector.load %arg14[%c0_32, %c0_33] : memref<128x32xf32, #tpu.memory_space<vmem>>, vector<128x32xf32>
    tpu.vector_store %arg14[%c0_32, %c0_33], %43 {strides = array<i32>} : memref<128x32xf32, #tpu.memory_space<vmem>>, vector<128x32xf32>,
    return
  }
  func.func @transform_0(%arg0: i32) -> (i32, i32) {
    %c0_i32 = arith.constant 0 : i32
    %c0_i32_0 = arith.constant 0 : i32
    return %arg0, %c0_i32 : i32, i32
  }
  func.func @transform_1(%arg0: i32) -> (i32, i32) {
    %c0_i32 = arith.constant 0 : i32
    %c0_i32_0 = arith.constant 0 : i32
    %c0_i32_1 = arith.constant 0 : i32
    return %c0_i32, %c0_i32_0 : i32, i32
  }
  func.func @transform_2(%arg0: i32) -> (i32, i32) {
    %c0_i32 = arith.constant 0 : i32
    %c0_i32_0 = arith.constant 0 : i32
    %c0_i32_1 = arith.constant 0 : i32
    return %c0_i32, %c0_i32_0 : i32, i32
  }
  func.func @transform_3(%arg0: i32) -> (i32, i32) {
    %c0_i32 = arith.constant 0 : i32
    %c0_i32_0 = arith.constant 0 : i32
    %c0_i32_1 = arith.constant 0 : i32
    return %c0_i32, %c0_i32_0 : i32, i32
  }
  func.func @transform_4(%arg0: i32) -> (i32, i32) {
    %c0_i32 = arith.constant 0 : i32
    %c0_i32_0 = arith.constant 0 : i32
    %c0_i32_1 = arith.constant 0 : i32
    return %c0_i32, %c0_i32_0 : i32, i32
  }
  func.func @transform_5(%arg0: i32) -> (i32, i32) {
    %c0_i32 = arith.constant 0 : i32
    %c0_i32_0 = arith.constant 0 : i32
    %c0_i32_1 = arith.constant 0 : i32
    return %c0_i32, %c0_i32_0 : i32, i32
  }
  func.func @transform_6(%arg0: i32) -> (i32, i32) {
    %c0_i32 = arith.constant 0 : i32
    %c0_i32_0 = arith.constant 0 : i32
    %c0_i32_1 = arith.constant 0 : i32
    return %c0_i32, %c0_i32_0 : i32, i32
  }
  func.func @transform_7(%arg0: i32) -> (i32, i32) {
    %c0_i32 = arith.constant 0 : i32
    %c0_i32_0 = arith.constant 0 : i32
    %c0_i32_1 = arith.constant 0 : i32
    return %c0_i32, %c0_i32_0 : i32, i32
  }
  func.func @transform_8(%arg0: i32) -> (i32, i32) {
    %c0_i32 = arith.constant 0 : i32
    %c0_i32_0 = arith.constant 0 : i32
    %c0_i32_1 = arith.constant 0 : i32
    return %c0_i32, %c0_i32_0 : i32, i32
  }
  func.func @transform_9(%arg0: i32) -> (i32, i32) {
    %c0_i32 = arith.constant 0 : i32
    %c0_i32_0 = arith.constant 0 : i32
    %c0_i32_1 = arith.constant 0 : i32
    return %c0_i32, %c0_i32_0 : i32, i32
  }
  func.func @transform_10(%arg0: i32) -> (i32, i32) {
    %c0_i32 = arith.constant 0 : i32
    %c0_i32_0 = arith.constant 0 : i32
    %c0_i32_1 = arith.constant 0 : i32
    return %c0_i32, %c0_i32_0 : i32, i32
  }
  func.func @transform_11(%arg0: i32) -> (i32, i32) {
    %c0_i32 = arith.constant 0 : i32
    %c0_i32_0 = arith.constant 0 : i32
    %c0_i32_1 = arith.constant 0 : i32
    return %c0_i32, %c0_i32_0 : i32, i32
  }
  func.func @transform_12(%arg0: i32) -> (i32, i32) {
    %c0_i32 = arith.constant 0 : i32
    %c0_i32_0 = arith.constant 0 : i32
    %c0_i32_1 = arith.constant 0 : i32
    return %c0_i32, %c0_i32_0 : i32, i32
  }
  func.func @transform_13(%arg0: i32) -> (i32, i32) {
    %c0_i32 = arith.constant 0 : i32
    %c0_i32_0 = arith.constant 0 : i32
    return %arg0, %c0_i32 : i32, i32
  }
  func.func @transform_14(%arg0: i32) -> (i32, i32) {
    %c0_i32 = arith.constant 0 : i32
    %c0_i32_0 = arith.constant 0 : i32
    return %c0_i32, %arg0 : i32, i32
  }
}

</mosaic_0001>

<bundles_post_ra>
// kernel: tpu_custom_call.1
= control target key start
LH: loop header
LB: loop body
LE: loop exit
PB: predicated region body
PF: predicated region fallthrough
CT: control target
= control target key end

     0   :  { %s683_s0 = inlined_call_operand.vmem [shape: f32[2,32], index: 0, kind: input, shape index: {}]   ;;  %s684_s1 = inlined_call_operand.vmem [shape: bf16[16,32], index: 1, kind: input, shape index: {}]   ;;  %s685_s2 = inlined_call_operand.vmem [shape: f32[16,1], index: 2, kind: input, shape index: {}]   ;;  %s686_s3 = inlined_call_operand.vmem [shape: bf16[8,16], index: 3, kind: input, shape index: {}]   ;;  %s687_s4 = inlined_call_operand.vmem [shape: f32[8,1], index: 4, kind: input, shape index: {}]   ;;  %s688_s5 = inlined_call_operand.vmem [shape: bf16[4,8], index: 5, kind: input, shape index: {}]   ;;  %s689_s6 = inlined_call_operand.vmem [shape: f32[4,1], index: 6, kind: input, shape index: {}]   ;;  %s690_s7 = inlined_call_operand.vmem [shape: bf16[8,4], index: 7, kind: input, shape index: {}]   ;;  %s691_s8 = inlined_call_operand.vmem [shape: f32[8,1], index: 8, kind: input, shape index: {}]   ;;  %s692_s9 = inlined_call_operand.vmem [shape: bf16[16,8], index: 9, kind: input, shape index: {}]   ;;  %s693_s10 = inlined_call_operand.vmem [shape: f32[16,1], index: 10, kind: input, shape index: {}]   ;;  %s694_s11 = inlined_call_operand.vmem [shape: bf16[32,16], index: 11, kind: input, shape index: {}]   ;;  %s695_s12 = inlined_call_operand.vmem [shape: f32[32,1], index: 12, kind: input, shape index: {}]   ;;  %s696_s13 = inlined_call_operand.hbm [shape: f32[2,32], index: 13, kind: output, shape index: {0}]   ;;  %s697_s14 = inlined_call_operand.vmem [shape: f32[4,2], index: 14, kind: output, shape index: {1}]  }
   0x1   :  { %v48_v0 = vld [vmem:[%s683_s0] sm:$0xff] }
   0x2   :  { %64 = vxpose.xlu0.b32.start [1/16] (narrow) %v48_v0, 32 }
   0x3   :  { %20 = vsyncpa [#allocation3], 0  ;;  %v49_v1 = vld [vmem:[%s683_s0 + $0x8] sm:$0xff]  ;;  %v50_v2 = vld [vmem:[%s683_s0 + $0x10] sm:$0xff]  ;;  %v472_v17 = vmov 0   ;;  %vm117_vm0 = vcmask 261120  }
   0x4   :  { %v51_v3 = vld [vmem:[%s683_s0 + $0x18] sm:$0xff]  ;;  %v52_v4 = vld [vmem:[%s683_s0 + $0x20] sm:$0xff]  ;;  %v53_v5 = vld [vmem:[%s683_s0 + $0x28] sm:$0xff]  ;;  %431 = vset.pattern.permute.xlu1 %v472_v17  ;;  %432 = vset.pattern.permute.xlu2 %v472_v17  ;;  %vm145_vm1 = vcmask 130048   ;;  %vm175_vm2 = vcmask 1043456   ;;  %vm171_vm3 = vcmask 64512  }
   0x5   :  { %v54_v6 = vld [vmem:[%s683_s0 + $0x30] sm:$0xff]  ;;  %v55_v7 = vld [vmem:[%s683_s0 + $0x38] sm:$0xff]  ;;  %v56_v8 = vld [vmem:[%s683_s0 + $0x40] sm:$0xff]  ;;  %vm205_vm4 = vcmask 1041408   ;;  %vm201_vm5 = vcmask 31744  }
   0x6   :  { %v57_v9 = vld [vmem:[%s683_s0 + $0x48] sm:$0xff]  ;;  %v58_v10 = vld [vmem:[%s683_s0 + $0x50] sm:$0xff]  ;;  %v59_v11 = vld [vmem:[%s683_s0 + $0x58] sm:$0xff] }
   0x7   :  { %v60_v12 = vld [vmem:[%s683_s0 + $0x60] sm:$0xff]  ;;  %v61_v13 = vld [vmem:[%s683_s0 + $0x68] sm:$0xff]  ;;  %v62_v14 = vld [vmem:[%s683_s0 + $0x70] sm:$0xff] }
   0x8   :  { %v63_v15 = vld [vmem:[%s683_s0 + $0x78] sm:$0xff]  ;;  %v100_v16 = vld [vmem:[%s685_s2] sm:$0xff]  ;;  %v101_v18 = vld [vmem:[%s685_s2 + $0x8] sm:$0xff] }
   0x9   :  { %104 = vperm.xlu1 %431, %v100_v16   ;;  %v195_v19 = vld [vmem:[%s691_s8] sm:$0xff]  ;;  %v227_v20 = vld [vmem:[%s693_s10 + $0x8] sm:$0xff]  ;;  %v273_v24 = vld [vmem:[%s695_s12 + $0x18] sm:$0xff] }
   0xa   :  { %65 = vxpose.xlu0.b32.cont [2/16] (narrow) %v49_v1, 32  ;;  %v271_v22 = vld [vmem:[%s695_s12 + $0x8] sm:$0xff]  ;;  %v422_v29 = vld [vmem:[%s684_s1] sm:$0xff]  ;;  %v272_v44 = vld [vmem:[%s695_s12 + $0x10] sm:$0xff] }
   0xb   :  { %v139_v30 = vld [vmem:[%s687_s4] sm:$0xff] }
   0xc   :  { %142 = vperm.xlu2 %432, %v139_v30   ;;  %v165_v31 = vld [vmem:[%s689_s6] sm:$0xf] }
   0xd   :  { %v226_v34 = vld [vmem:[%s693_s10] sm:$0xff] }
   0xe   :  { %v270_v39 = vld [vmem:[%s695_s12] sm:$0xff] }
   0xf   :  { %v138_v43 = vld [vmem:[%s686_s3] sm:$0xf] }
  0x10   :  { %v164_v52 = vld [vmem:[%s688_s5] sm:$0x3] }
  0x11   :  { %109 = vperm.xlu1 %431, %v101_v18   ;;  %v194_v58 = vld [vmem:[%s690_s7] sm:$0xf] }
  0x12   :  { %66 = vxpose.xlu0.b32.cont [3/16] (narrow) %v50_v2, 32 }
  0x14   :  { %168 = vperm.xlu2 %432, %v165_v31  }
  0x19   :  { %198 = vperm.xlu1 %431, %v195_v19  }
  0x1a   :  { %67 = vxpose.xlu0.b32.cont [4/16] (narrow) %v51_v3, 32  ;;  %v423_v3 = vld [vmem:[%s692_s9] sm:$0xff] }
  0x1c   :  { %230 = vperm.xlu2 %432, %v226_v34  }
  0x21   :  { %235 = vperm.xlu1 %431, %v227_v20  }
  0x22   :  { %68 = vxpose.xlu0.b32.cont [5/16] (narrow) %v52_v4, 32 }
  0x24   :  { %276 = vperm.xlu2 %432, %v270_v39  }
  0x29   :  { %281 = vperm.xlu1 %431, %v271_v22  }
  0x2a   :  { %69 = vxpose.xlu0.b32.cont [6/16] (narrow) %v53_v5, 32 }
  0x2c   :  { %286 = vperm.xlu2 %432, %v272_v44  }
  0x31   :  { %291 = vperm.xlu1 %431, %v273_v24  }
  0x32   :  { %70 = vxpose.xlu0.b32.cont [7/16] (narrow) %v54_v6, 32 }
  0x3a   :  { %71 = vxpose.xlu0.b32.cont [8/16] (narrow) %v55_v7, 32 }
  0x42   :  { %72 = vxpose.xlu0.b32.cont [9/16] (narrow) %v56_v8, 32 }
  0x4a   :  { %73 = vxpose.xlu0.b32.cont [10/16] (narrow) %v57_v9, 32 }
  0x52   :  { %74 = vxpose.xlu0.b32.cont [11/16] (narrow) %v58_v10, 32 }
  0x5a   :  { %75 = vxpose.xlu0.b32.cont [12/16] (narrow) %v59_v11, 32 }
  0x62   :  { %76 = vxpose.xlu0.b32.cont [13/16] (narrow) %v60_v12, 32 }
  0x66   :  { %v143_v45 = vpop.permute.xlu2 %142 }
  0x6a   :  { %77 = vxpose.xlu0.b32.cont [14/16] (narrow) %v61_v13, 32  ;;  %v424_v13 = vld [vmem:[%s694_s11] sm:$0xff] }
  0x6e   :  { %v169_v53 = vpop.permute.xlu2 %168 }
  0x72   :  { %78 = vxpose.xlu0.b32.cont [15/16] (narrow) %v62_v14, 32  ;;  %v425_v14 = vld [vmem:[%s694_s11 + $0x8] sm:$0xff] }
  0x76   :  { %v231_v5 = vpop.permute.xlu2 %230 }
  0x7a   :  { %79 = vxpose.xlu0.b32.end [16/16] (narrow) %v63_v15, 32 }
  0x7b   :  { %v105_v32 = vpop.permute.xlu1 %104 }
  0x7e   :  { %v277_v15 = vpop.permute.xlu2 %276 }
  0x83   :  { %v110_v36 = vpop.permute.xlu1 %109 }
  0x8b   :  { %v199_v60 = vpop.permute.xlu1 %198 }
  0x93   :  { %v236_v7 = vpop.permute.xlu1 %235 }
  0x9b   :  { %v282_v18 = vpop.permute.xlu1 %281 }
  0xa3   :  { %v292_v24 = vpop.permute.xlu1 %291 }
  0xa6   :  { %v80_v21 = vpop.trf.xlu0 }
  0xae   :  { %v81_v23 = vpop.trf.xlu0 }
  0xaf   :  { %v96_v28 = vpack.c.bf16 %v81_v23, %v80_v21  ;;  %v287_v21 = vpop.permute.xlu2 %286 }
  0xb6   :  { %v82_v25 = vpop.trf.xlu0 }
  0xbe   :  { %v83_v26 = vpop.trf.xlu0 }
  0xbf   :  { %v97_v27 = vpack.c.bf16 %v83_v26, %v82_v25 }
  0xc1   :  { %127 = vmatpush.bf16.msra.mxu0 %v97_v27 }
  0xc5   :  { %128 = vmatpush.bf16.msra.mxu0 %v96_v28 }
  0xc8   :  { %403 = vmatmul.msk.bf16.vlgmr.msra.gmra.mxu0 %vm117_vm0, %v422_v29 }
  0xe1   :  { %433 = vset.pattern.permute.xlu0 %v472_v17 }
 0x145   :  { %v130_v33 = vpop.f32.mrf.mxu0 }
 0x146   :  { %v131_v35 = vadd.f32 %v130_v33, %v105_v32 }
 0x148   :  { %434 = vtanh.f32 %v131_v35 }
 0x14d   :  { %v132_v37 = vpop.f32.mrf.mxu0 }
 0x14e   :  { %v133_v38 = vadd.f32 %v132_v37, %v110_v36  ;;  %v435_v40 = vpop.eup %434 }
 0x150   :  { %436 = vtanh.f32 %v133_v38 }
 0x156   :  { %v437_v41 = vpop.eup %436 }
 0x157   :  { %v137_v42 = vpack.c.bf16 %v437_v41, %v435_v40 }
 0x159   :  { %156 = vmatpush.bf16.msra.mxu1 %v137_v42 }
 0x15c   :  { %404 = vmatmul.msk.bf16.vlgmr.msra.gmra.mxu1 %vm145_vm1, %v138_v43 }
 0x1d9   :  { %v158_v46 = vpop.f32.mrf.mxu1 }
 0x1da   :  { %v159_v47 = vadd.f32 %v158_v46, %v143_v45 }
 0x1dc   :  { %438 = vtanh.f32 %v159_v47 }
 0x1e1   :  { %v160_v48 = vpop.f32.mrf.mxu1 }
 0x1e2   :  { %v439_v49 = vpop.eup %438 }
 0x1e3   :  { %v163_v50 = vpack.c.bf16 %v439_v49, %v439_v49 }
 0x1e5   :  { %v177_v51 = vsel %vm175_vm2, %v163_v50, 0 }
 0x1e6   :  { %186 = vmatpush.bf16.msra.mxu3 %v177_v51 }
 0x1e9   :  { %405 = vmatmul.msk.bf16.vlgmr.msra.gmra.mxu3 %vm171_vm3, %v164_v52 }
 0x26c   :  { %v188_v54 = vpop.f32.mrf.mxu3 }
 0x26d   :  { %v189_v55 = vadd.f32 %v188_v54, %v169_v53 }
 0x26f   :  { %192 = vst [vmem:[%s697_s14] sm:$0xf] %v189_v55  ;;  %v193_v56 = vpack.c.bf16 %v189_v55, %v189_v55 }
 0x271   :  { %v207_v57 = vsel %vm205_vm4, %v193_v56, 0 }
 0x272   :  { %216 = vmatpush.bf16.msrb.mxu3 %v207_v57 }
 0x274   :  { %v190_v59 = vpop.f32.mrf.mxu3 }
 0x275   :  { %406 = vmatmul.msk.bf16.vlgmr.msrb.gmra.mxu3 %vm201_vm5, %v194_v58 }
 0x2f8   :  { %v218_v61 = vpop.f32.mrf.mxu3 }
 0x2f9   :  { %v219_v62 = vadd.f32 %v218_v61, %v199_v60 }
 0x2fb   :  { %440 = vtanh.f32 %v219_v62 }
 0x300   :  { %v220_v63 = vpop.f32.mrf.mxu3 }
 0x301   :  { %v441_v0 = vpop.eup %440 }
 0x302   :  { %v223_v1 = vpack.c.bf16 %v441_v0, %v441_v0 }
 0x304   :  { %v247_v2 = vsel %vm175_vm2, %v223_v1, 0 }
 0x305   :  { %256 = vmatpush.bf16.msrb.mxu1 %v247_v2 }
 0x308   :  { %411 = vmatmul.msk.bf16.vlgmr.msrb.gmra.mxu1 %vm171_vm3, %v423_v3 }
 0x385   :  { %v258_v4 = vpop.f32.mrf.mxu1 }
 0x386   :  { %v259_v6 = vadd.f32 %v258_v4, %v231_v5 }
 0x388   :  { %442 = vtanh.f32 %v259_v6 }
 0x38d   :  { %v260_v8 = vpop.f32.mrf.mxu1 }
 0x38e   :  { %v261_v9 = vadd.f32 %v260_v8, %v236_v7  ;;  %v443_v10 = vpop.eup %442 }
 0x390   :  { %444 = vtanh.f32 %v261_v9 }
 0x396   :  { %v445_v11 = vpop.eup %444 }
 0x397   :  { %v265_v12 = vpack.c.bf16 %v445_v11, %v443_v10 }
 0x399   :  { %317 = vmatpush.bf16.msra.mxu2 %v265_v12 }
 0x39c   :  { %420 = vmatmul.msk.bf16.vlgmr.msra.gmra.mxu2 %vm145_vm1, %v424_v13 }
 0x3ac   :  { %421 = vmatmul.msk.bf16.gmra.mxu2 %vm145_vm1, %v425_v14 }
 0x41f   :  { %v319_v16 = vpop.f32.mrf.mxu2 }
 0x420   :  { %v320_v17 = vadd.f32 %v319_v16, %v277_v15 }
 0x422   :  { %329 = vxpose.xlu2.b32.start [1/4] (short) %v320_v17, 128 }
 0x427   :  { %v321_v19 = vpop.f32.mrf.mxu2 }
 0x428   :  { %v322_v20 = vadd.f32 %v321_v19, %v282_v18 }
 0x42a   :  { %330 = vxpose.xlu2.b32.cont [2/4] (short) %v322_v20, 128 }
 0x42f   :  { %v324_v22 = vpop.f32.mrf.mxu2 }
 0x430   :  { %v325_v23 = vadd.f32 %v324_v22, %v287_v21 }
 0x432   :  { %331 = vxpose.xlu2.b32.cont [3/4] (short) %v325_v23, 128 }
 0x437   :  { %v326_v25 = vpop.f32.mrf.mxu2 }
 0x438   :  { %v327_v26 = vadd.f32 %v326_v25, %v292_v24 }
 0x43a   :  { %332 = vxpose.xlu2.b32.end [4/4] (short) %v327_v26, 128 }
 0x4bb   :  { %v345_v27 = vpop.trf.xlu2 }
 0x4bc   :  { %361 = vst.msk [vmem:[#allocation2] sm:$0xff] %vm117_vm0, %v345_v27 }
 0x4c3   :  { %v346_v28 = vpop.trf.xlu2 }
 0x4c4   :  { %362 = vst.msk [vmem:[#allocation2 + $0x8] sm:$0xff] %vm117_vm0, %v346_v28 }
 0x4cb   :  { %v347_v29 = vpop.trf.xlu2 }
 0x4cc   :  { %363 = vst.msk [vmem:[#allocation2 + $0x10] sm:$0xff] %vm117_vm0, %v347_v29 }
 0x4d3   :  { %v348_v30 = vpop.trf.xlu2 }
 0x4d4   :  { %364 = vst.msk [vmem:[#allocation2 + $0x18] sm:$0xff] %vm117_vm0, %v348_v30 }
 0x4db   :  { %v349_v31 = vpop.trf.xlu2 }
 0x4dc   :  { %365 = vst.msk [vmem:[#allocation2 + $0x20] sm:$0xff] %vm117_vm0, %v349_v31 }
 0x4e3   :  { %v350_v32 = vpop.trf.xlu2 }
 0x4e4   :  { %366 = vst.msk [vmem:[#allocation2 + $0x28] sm:$0xff] %vm117_vm0, %v350_v32 }
 0x4eb   :  { %v351_v33 = vpop.trf.xlu2 }
 0x4ec   :  { %367 = vst.msk [vmem:[#allocation2 + $0x30] sm:$0xff] %vm117_vm0, %v351_v33 }
 0x4f3   :  { %v352_v34 = vpop.trf.xlu2 }
 0x4f4   :  { %368 = vst.msk [vmem:[#allocation2 + $0x38] sm:$0xff] %vm117_vm0, %v352_v34 }
 0x4fb   :  { %v353_v35 = vpop.trf.xlu2 }
 0x4fc   :  { %369 = vst.msk [vmem:[#allocation2 + $0x40] sm:$0xff] %vm117_vm0, %v353_v35 }
 0x503   :  { %v354_v36 = vpop.trf.xlu2 }
 0x504   :  { %370 = vst.msk [vmem:[#allocation2 + $0x48] sm:$0xff] %vm117_vm0, %v354_v36 }
 0x50b   :  { %v355_v37 = vpop.trf.xlu2 }
 0x50c   :  { %371 = vst.msk [vmem:[#allocation2 + $0x50] sm:$0xff] %vm117_vm0, %v355_v37 }
 0x513   :  { %v356_v38 = vpop.trf.xlu2 }
 0x514   :  { %372 = vst.msk [vmem:[#allocation2 + $0x58] sm:$0xff] %vm117_vm0, %v356_v38 }
 0x51b   :  { %v357_v39 = vpop.trf.xlu2 }
 0x51c   :  { %373 = vst.msk [vmem:[#allocation2 + $0x60] sm:$0xff] %vm117_vm0, %v357_v39 }
 0x523   :  { %v358_v40 = vpop.trf.xlu2 }
 0x524   :  { %374 = vst.msk [vmem:[#allocation2 + $0x68] sm:$0xff] %vm117_vm0, %v358_v40 }
 0x52b   :  { %v359_v41 = vpop.trf.xlu2 }
 0x52c   :  { %375 = vst.msk [vmem:[#allocation2 + $0x70] sm:$0xff] %vm117_vm0, %v359_v41 }
 0x533   :  { %v360_v42 = vpop.trf.xlu2 }
 0x534   :  { %376 = vst.msk [vmem:[#allocation2 + $0x78] sm:$0xff] %vm117_vm0, %v360_v42 }
 0x535   :  { %380 = vsyncadd [#allocation3], 2016  ;;  %s383_s22 = sshll.u32 %s696_s13, 4  ;;  %s473_s2 = smov [#allocation2]   ;;  %s384_s22 = int_to_ptr.hbm [resolvable:$true] %s383_s22 }
 0x536   :  { %s381_s8 = sshll.u32 %s473_s2, 4  ;;  %s474_s23 = smov 32   ;;  %s382_s8 = int_to_ptr.vmem [resolvable:$true] %s381_s8 }
 0x537   :  { %s475_s24 = smov 2  }
 0x538   :  { %389 = dma.vmem_to_hbm [thread:$0]  %s382_s8, 32, %s384_s22, [#allocation3], %s474_s23, %s474_s23, %s475_s24  }
 0x539   :  { %470 = dma.done.wait [#allocation3], 2048  }
 0x53a   :  { %471 = vsyncadd [#allocation3], 4294965248 }
 0x53b   :  { %398 = vsyncpa [#allocation3], 1 }

</bundles_post_ra>
